<compile_context>
chip_gen: v5e
topology: v5e:2x2
jax: 0.10.0
libtpu: 0.0.40
codegen_flags: <defaults>
</compile_context>

<pallas_src>
import math

import jax
import jax.numpy as jnp
from jax.experimental import pallas as pl
from jax.experimental.pallas import tpu as pltpu

# ----------------------------- configuration --------------------------------
BS = 2          # batch
SEQ = 8         # sequence length
D_MODEL = 32    # d_model
DK = 8          # dk
HEADS = 4       # heads (HEADS * DK == D_MODEL)
EPS = 1e-6

F32 = jnp.float32


# ------------------------------ kernel helpers -------------------------------
def _norm_rows(x):
    # torch NormLayer: (x - mean) / (std_unbiased + eps); alpha/bias unused.
    mean = jnp.mean(x, axis=-1, keepdims=True)
    d = x - mean
    var = jnp.sum(d * d, axis=-1, keepdims=True) * (1.0 / (x.shape[-1] - 1))
    # exact EUP reciprocal (multiply instead of divide)
    return d * pl.reciprocal(jnp.sqrt(var) + EPS)


# -------------------------------- the kernel ---------------------------------
def encoder_layer_kernel(x_ref, wqkv_ref, bqkv_ref, wof_ref, bof_ref, out_ref):
    """Processes `bb` batch elements per grid step (bb = x_ref.shape[0])."""
    bb = x_ref.shape[0]
    rows = bb * SEQ
    x = x_ref[...].reshape(rows, D_MODEL)            # rows ordered (batch, seq)

    # ---- norm_1 + fused QKV projection (one MXU pass) ----
    x1 = _norm_rows(x)
    qkv = jnp.dot(x1, wqkv_ref[...], preferred_element_type=F32) + bqkv_ref[...]

    inv_sqrt_dk = 1.0 / math.sqrt(DK)
    ohs = []
    for h in range(HEADS):                            # static unrolled loop
        qh = qkv[:, h * DK:(h + 1) * DK].reshape(bb, SEQ, DK)
        kh = qkv[:, D_MODEL + h * DK:D_MODEL + (h + 1) * DK].reshape(bb, SEQ, DK)
        vh = qkv[:, 2 * D_MODEL + h * DK:2 * D_MODEL + (h + 1) * DK].reshape(bb, SEQ, DK)

        s = jnp.einsum('bqd,bkd->bqk', qh, kh,
                       preferred_element_type=F32) * inv_sqrt_dk      # (bb,SEQ,SEQ)
        m = jnp.max(s, axis=-1, keepdims=True)
        e = jnp.exp(s - m)
        p = e * pl.reciprocal(jnp.sum(e, axis=-1, keepdims=True), approx=True)
        # TODO(synk): attention-score dropout omitted (eval-mode identity).
        oh = jnp.einsum('bqk,bkd->bqd', p, vh, preferred_element_type=F32)
        ohs.append(oh.reshape(rows, DK))

    # single consolidated output projection (instead of 4 tiny per-head matmuls)
    concat = jnp.concatenate(ohs, axis=-1)            # (rows, D_MODEL)
    attn = jnp.dot(concat, wof_ref[0], preferred_element_type=F32) + bof_ref[0]

    x2 = x + attn
    x3 = _norm_rows(x2)
    x4 = x2 + jnp.dot(x3, wof_ref[1], preferred_element_type=F32) + bof_ref[1]

    out_ref[...] = x4.reshape(bb, SEQ, D_MODEL)


# -------------------------------- wrapper ------------------------------------
def _single_tensorcore_chip():
    """True on v5e/v6e (1 TC/chip); False (keep batch-parallel grid) otherwise."""
    try:
        kind = jax.devices()[0].device_kind.lower().replace(" ", "")
    except Exception:
        return False
    return any(tag in kind for tag in ("v5lite", "v5e", "v6lite", "v6e"))


def encoder_layer_forward(x, packed_params):
    wqkv, bqkv, wof, bof = packed_params

    # v5e/v6e: one grid step, whole batch in one invocation (no per-step overhead).
    # v7x (2 TCs/chip): one batch element per step, parallel axis -> one per core.
    bs_block = BS if _single_tensorcore_chip() else 1
    grid = (BS // bs_block,)

    def full_spec(shape):
        nd = len(shape)
        return pl.BlockSpec(shape, lambda b, _nd=nd: (0,) * _nd)

    in_specs = [
        pl.BlockSpec((bs_block, SEQ, D_MODEL), lambda b: (b, 0, 0)),
        full_spec(wqkv.shape),
        full_spec(bqkv.shape),
        full_spec(wof.shape),
        full_spec(bof.shape),
    ]
    out_specs = pl.BlockSpec((bs_block, SEQ, D_MODEL), lambda b: (b, 0, 0))

    return pl.pallas_call(
        encoder_layer_kernel,
        out_shape=jax.ShapeDtypeStruct((BS, SEQ, D_MODEL), F32),
        grid_spec=pltpu.PrefetchScalarGridSpec(
            num_scalar_prefetch=0,
            grid=grid,
            in_specs=in_specs,
            out_specs=out_specs,
        ),
        compiler_params=pltpu.CompilerParams(
            dimension_semantics=("parallel",)),
    )(x, wqkv, bqkv, wof, bof)


# --------------------------- deterministic params ----------------------------
def init_params(key):
    keys = iter(jax.random.split(key, 16))

    def w(shape, scale=0.15):
        return (jax.random.normal(next(keys), shape, F32) * scale).astype(F32)

    # Linear weights stored (in_features, out_features): y = x @ W + b
    wq = w((D_MODEL, D_MODEL)); bq = w((D_MODEL,))
    wk = w((D_MODEL, D_MODEL)); bk = w((D_MODEL,))
    wv = w((D_MODEL, D_MODEL)); bv = w((D_MODEL,))
    wo = w((D_MODEL, D_MODEL)); bo = w((D_MODEL,))
    wfc = w((D_MODEL, D_MODEL)); bfc = w((D_MODEL,))
    return (wq, bq, wk, bk, wv, bv, wo, bo, wfc, bfc)


def pack_params(p):
    """Host-side packing into 4 tensors (fewer refs / DMAs per grid step)."""
    wq, bq, wk, bk, wv, bv, wo, bo, wfc, bfc = p
    wqkv = jnp.concatenate([wq, wk, wv], axis=1)              # (32, 96)
    bqkv = jnp.concatenate([bq, bk, bv], axis=0)[None, :]     # (1, 96)
    wof = jnp.stack([wo, wfc], axis=0)                        # (2, 32, 32)
    bof = jnp.stack([bo, bfc], axis=0)[:, None, :]            # (2, 1, 32)
    return wqkv, bqkv, wof, bof


# ------------------------------ pure-JAX reference ---------------------------
def reference(x, p):
    wq, bq, wk, bk, wv, bv, wo, bo, wfc, bfc = p

    def norm(t):
        m = jnp.mean(t, -1, keepdims=True)
        d = t - m
        var = jnp.sum(d * d, -1, keepdims=True) / (t.shape[-1] - 1)
        return d / (jnp.sqrt(var) + EPS)

    def split_heads(t):
        return t.reshape(BS, SEQ, HEADS, DK).transpose(0, 2, 1, 3)

    x1 = norm(x)
    q = split_heads(x1 @ wq + bq)
    k = split_heads(x1 @ wk + bk)
    v = split_heads(x1 @ wv + bv)
    s = jnp.einsum('bhqd,bhkd->bhqk', q, k) / math.sqrt(DK)
    pr = jax.nn.softmax(s, axis=-1)
    o = jnp.einsum('bhqk,bhkd->bhqd', pr, v)
    concat = o.transpose(0, 2, 1, 3).reshape(BS, SEQ, D_MODEL)
    attn = concat @ wo + bo
    x2 = x + attn
    x3 = norm(x2)
    return x2 + x3 @ wfc + bfc


# ----------------------------------- main -------------------------------------
if __name__ == "__main__":
    key = jax.random.PRNGKey(0)
    kx, kp = jax.random.split(key)

    x = jax.random.normal(kx, (BS, SEQ, D_MODEL), F32)
    params = init_params(kp)
    packed = pack_params(params)

    out = encoder_layer_forward(x, packed)
    jax.block_until_ready(out)

    with jax.default_matmul_precision("highest"):
        ref = reference(x, params)

    assert out.shape == (BS, SEQ, D_MODEL)
    max_err = float(jnp.max(jnp.abs(out - ref)))
    # Tolerance tightened from 1e-2 -> 5e-3; the remaining slack covers the
    # approximate EUP reciprocal used for the softmax denominator (everything
    # else runs in full f32).
    assert max_err < 5e-3, f"mismatch vs reference: {max_err}"

    print("KERNEL_OK")
</pallas_src>

<mosaic_0001>
module attributes {stable_mosaic.version = 11 : i64} {
  func.func @encoder_layer_kernel(%arg0: i32, %arg1: memref<1x8x32xf32, #tpu.memory_space<vmem>>, %arg2: memref<32x96xf32, #tpu.memory_space<vmem>>, %arg3: memref<1x96xf32, #tpu.memory_space<vmem>>, %arg4: memref<2x32x32xf32, #tpu.memory_space<vmem>>, %arg5: memref<2x1x32xf32, #tpu.memory_space<vmem>>, %arg6: memref<1x8x32xf32, #tpu.memory_space<vmem>>) attributes {dimension_semantics = [#tpu.dimension_semantics<parallel>], iteration_bounds = array<i64: 2>, scalar_prefetch = 0 : i64, scratch_operands = 0 : i64, tpu.core_type = #tpu.core_type<tc>, window_params = [{transform_indices = @transform_0, window_bounds = array<i64: 1, 8, 32>}, {pipeline_mode = #tpu.pipeline_mode<synchronous>, transform_indices = @transform_1, window_bounds = array<i64: 32, 96>}, {pipeline_mode = #tpu.pipeline_mode<synchronous>, transform_indices = @transform_2, window_bounds = array<i64: 1, 96>}, {pipeline_mode = #tpu.pipeline_mode<synchronous>, transform_indices = @transform_3, window_bounds = array<i64: 2, 32, 32>}, {pipeline_mode = #tpu.pipeline_mode<synchronous>, transform_indices = @transform_4, window_bounds = array<i64: 2, 1, 32>}, {transform_indices = @transform_5, window_bounds = array<i64: 1, 8, 32>}]} {
    %c0 = arith.constant 0 : index
    %c0_0 = arith.constant 0 : index
    %c0_1 = arith.constant 0 : index
    %0 = vector.load %arg1[%c0, %c0_0, %c0_1] : memref<1x8x32xf32, #tpu.memory_space<vmem>>, vector<1x8x32xf32>
    %1 = vector.shape_cast %0 : vector<1x8x32xf32> to vector<8x32xf32>
    %cst = arith.constant dense<0.000000e+00> : vector<8xf32>
    %2 = vector.multi_reduction <add>, %1, %cst [1] : vector<8x32xf32> to vector<8xf32>
    %3 = vector.shape_cast %2 : vector<8xf32> to vector<8x1xf32>
    %cst_2 = arith.constant 3.200000e+01 : f32
    %4 = vector.broadcast %cst_2 : f32 to vector<8x1xf32>
    %5 = arith.divf %3, %4 : vector<8x1xf32>
    %6 = vector.broadcast %5 : vector<8x1xf32> to vector<8x32xf32>
    %7 = arith.subf %1, %6 : vector<8x32xf32>
    %8 = arith.mulf %7, %7 : vector<8x32xf32>
    %cst_3 = arith.constant dense<0.000000e+00> : vector<8xf32>
    %9 = vector.multi_reduction <add>, %8, %cst_3 [1] : vector<8x32xf32> to vector<8xf32>
    %10 = vector.shape_cast %9 : vector<8xf32> to vector<8x1xf32>
    %cst_4 = arith.constant 0.0322580636 : f32
    %11 = vector.broadcast %cst_4 : f32 to vector<8x1xf32>
    %12 = arith.mulf %10, %11 : vector<8x1xf32>
    %13 = math.sqrt %12 : vector<8x1xf32>
    %cst_5 = arith.constant 9.99999997E-7 : f32
    %14 = vector.broadcast %cst_5 : f32 to vector<8x1xf32>
    %15 = arith.addf %13, %14 : vector<8x1xf32>
    %16 = tpu.reciprocal %15 : vector<8x1xf32> -> vector<8x1xf32>
    %17 = vector.broadcast %16 : vector<8x1xf32> to vector<8x32xf32>
    %18 = arith.mulf %7, %17 : vector<8x32xf32>
    %c0_6 = arith.constant 0 : index
    %c0_7 = arith.constant 0 : index
    %19 = vector.load %arg2[%c0_6, %c0_7] : memref<32x96xf32, #tpu.memory_space<vmem>>, vector<32x96xf32>
    %cst_8 = arith.constant dense<0.000000e+00> : vector<8x96xf32>
    %20 = tpu.matmul %18, %19, %cst_8 {dimension_numbers = #tpu.dot_dimension_numbers<[1], [0], [0], [1], [0, 0, 1, 1], [], []>} : vector<8x32xf32>, vector<32x96xf32>, vector<8x96xf32> -> vector<8x96xf32>
    %c0_9 = arith.constant 0 : index
    %c0_10 = arith.constant 0 : index
    %21 = vector.load %arg3[%c0_9, %c0_10] : memref<1x96xf32, #tpu.memory_space<vmem>>, vector<1x96xf32>
    %22 = vector.broadcast %21 : vector<1x96xf32> to vector<8x96xf32>
    %23 = arith.addf %20, %22 : vector<8x96xf32>
    %24 = vector.extract_strided_slice %23 {offsets = [0, 0], sizes = [8, 8], strides = [1, 1]} : vector<8x96xf32> to vector<8x8xf32>
    %25 = vector.shape_cast %24 : vector<8x8xf32> to vector<1x8x8xf32>
    %26 = vector.extract_strided_slice %23 {offsets = [0, 32], sizes = [8, 8], strides = [1, 1]} : vector<8x96xf32> to vector<8x8xf32>
    %27 = vector.shape_cast %26 : vector<8x8xf32> to vector<1x8x8xf32>
    %28 = vector.extract_strided_slice %23 {offsets = [0, 64], sizes = [8, 8], strides = [1, 1]} : vector<8x96xf32> to vector<8x8xf32>
    %29 = vector.shape_cast %28 : vector<8x8xf32> to vector<1x8x8xf32>
    "tpu.trace_start"() <{level = 10 : i32, message = "bqd,bkd->bqk"}> : () -> ()
    %cst_11 = arith.constant dense<0.000000e+00> : vector<1x8x8xf32>
    %30 = tpu.matmul %25, %27, %cst_11 {dimension_numbers = #tpu.dot_dimension_numbers<[2], [2], [1], [1], [0, 0, 0, 1, 1, 1], [0], [0]>} : vector<1x8x8xf32>, vector<1x8x8xf32>, vector<1x8x8xf32> -> vector<1x8x8xf32>
    "tpu.trace_stop"() : () -> ()
    %cst_12 = arith.constant 0.353553385 : f32
    %31 = vector.broadcast %cst_12 : f32 to vector<1x8x8xf32>
    %32 = arith.mulf %30, %31 : vector<1x8x8xf32>
    %cst_13 = arith.constant dense<0xFF800000> : vector<1x8xf32>
    %33 = vector.multi_reduction <maximumf>, %32, %cst_13 [2] : vector<1x8x8xf32> to vector<1x8xf32>
    %34 = vector.shape_cast %33 : vector<1x8xf32> to vector<1x8x1xf32>
    %35 = vector.broadcast %34 : vector<1x8x1xf32> to vector<1x8x8xf32>
    %36 = arith.subf %32, %35 : vector<1x8x8xf32>
    %37 = math.exp %36 : vector<1x8x8xf32>
    %cst_14 = arith.constant dense<0.000000e+00> : vector<1x8xf32>
    %38 = vector.multi_reduction <add>, %37, %cst_14 [2] : vector<1x8x8xf32> to vector<1x8xf32>
    %39 = vector.shape_cast %38 : vector<1x8xf32> to vector<1x8x1xf32>
    %40 = tpu.reciprocal %39 {approx = true} : vector<1x8x1xf32> -> vector<1x8x1xf32>
    %41 = vector.broadcast %40 : vector<1x8x1xf32> to vector<1x8x8xf32>
    %42 = arith.mulf %37, %41 : vector<1x8x8xf32>
    "tpu.trace_start"() <{level = 10 : i32, message = "bqk,bkd->bqd"}> : () -> ()
    %cst_15 = arith.constant dense<0.000000e+00> : vector<1x8x8xf32>
    %43 = tpu.matmul %42, %29, %cst_15 {dimension_numbers = #tpu.dot_dimension_numbers<[2], [1], [1], [2], [0, 0, 0, 1, 1, 2], [0], [0]>} : vector<1x8x8xf32>, vector<1x8x8xf32>, vector<1x8x8xf32> -> vector<1x8x8xf32>
    "tpu.trace_stop"() : () -> ()
    %44 = vector.shape_cast %43 : vector<1x8x8xf32> to vector<8x8xf32>
    %45 = vector.extract_strided_slice %23 {offsets = [0, 8], sizes = [8, 8], strides = [1, 1]} : vector<8x96xf32> to vector<8x8xf32>
    %46 = vector.shape_cast %45 : vector<8x8xf32> to vector<1x8x8xf32>
    %47 = vector.extract_strided_slice %23 {offsets = [0, 40], sizes = [8, 8], strides = [1, 1]} : vector<8x96xf32> to vector<8x8xf32>
    %48 = vector.shape_cast %47 : vector<8x8xf32> to vector<1x8x8xf32>
    %49 = vector.extract_strided_slice %23 {offsets = [0, 72], sizes = [8, 8], strides = [1, 1]} : vector<8x96xf32> to vector<8x8xf32>
    %50 = vector.shape_cast %49 : vector<8x8xf32> to vector<1x8x8xf32>
    "tpu.trace_start"() <{level = 10 : i32, message = "bqd,bkd->bqk"}> : () -> ()
    %cst_16 = arith.constant dense<0.000000e+00> : vector<1x8x8xf32>
    %51 = tpu.matmul %46, %48, %cst_16 {dimension_numbers = #tpu.dot_dimension_numbers<[2], [2], [1], [1], [0, 0, 0, 1, 1, 1], [0], [0]>} : vector<1x8x8xf32>, vector<1x8x8xf32>, vector<1x8x8xf32> -> vector<1x8x8xf32>
    "tpu.trace_stop"() : () -> ()
    %cst_17 = arith.constant 0.353553385 : f32
    %52 = vector.broadcast %cst_17 : f32 to vector<1x8x8xf32>
    %53 = arith.mulf %51, %52 : vector<1x8x8xf32>
    %cst_18 = arith.constant dense<0xFF800000> : vector<1x8xf32>
    %54 = vector.multi_reduction <maximumf>, %53, %cst_18 [2] : vector<1x8x8xf32> to vector<1x8xf32>
    %55 = vector.shape_cast %54 : vector<1x8xf32> to vector<1x8x1xf32>
    %56 = vector.broadcast %55 : vector<1x8x1xf32> to vector<1x8x8xf32>
    %57 = arith.subf %53, %56 : vector<1x8x8xf32>
    %58 = math.exp %57 : vector<1x8x8xf32>
    %cst_19 = arith.constant dense<0.000000e+00> : vector<1x8xf32>
    %59 = vector.multi_reduction <add>, %58, %cst_19 [2] : vector<1x8x8xf32> to vector<1x8xf32>
    %60 = vector.shape_cast %59 : vector<1x8xf32> to vector<1x8x1xf32>
    %61 = tpu.reciprocal %60 {approx = true} : vector<1x8x1xf32> -> vector<1x8x1xf32>
    %62 = vector.broadcast %61 : vector<1x8x1xf32> to vector<1x8x8xf32>
    %63 = arith.mulf %58, %62 : vector<1x8x8xf32>
    "tpu.trace_start"() <{level = 10 : i32, message = "bqk,bkd->bqd"}> : () -> ()
    %cst_20 = arith.constant dense<0.000000e+00> : vector<1x8x8xf32>
    %64 = tpu.matmul %63, %50, %cst_20 {dimension_numbers = #tpu.dot_dimension_numbers<[2], [1], [1], [2], [0, 0, 0, 1, 1, 2], [0], [0]>} : vector<1x8x8xf32>, vector<1x8x8xf32>, vector<1x8x8xf32> -> vector<1x8x8xf32>
    "tpu.trace_stop"() : () -> ()
    %65 = vector.shape_cast %64 : vector<1x8x8xf32> to vector<8x8xf32>
    %66 = vector.extract_strided_slice %23 {offsets = [0, 16], sizes = [8, 8], strides = [1, 1]} : vector<8x96xf32> to vector<8x8xf32>
    %67 = vector.shape_cast %66 : vector<8x8xf32> to vector<1x8x8xf32>
    %68 = vector.extract_strided_slice %23 {offsets = [0, 48], sizes = [8, 8], strides = [1, 1]} : vector<8x96xf32> to vector<8x8xf32>
    %69 = vector.shape_cast %68 : vector<8x8xf32> to vector<1x8x8xf32>
    %70 = vector.extract_strided_slice %23 {offsets = [0, 80], sizes = [8, 8], strides = [1, 1]} : vector<8x96xf32> to vector<8x8xf32>
    %71 = vector.shape_cast %70 : vector<8x8xf32> to vector<1x8x8xf32>
    "tpu.trace_start"() <{level = 10 : i32, message = "bqd,bkd->bqk"}> : () -> ()
    %cst_21 = arith.constant dense<0.000000e+00> : vector<1x8x8xf32>
    %72 = tpu.matmul %67, %69, %cst_21 {dimension_numbers = #tpu.dot_dimension_numbers<[2], [2], [1], [1], [0, 0, 0, 1, 1, 1], [0], [0]>} : vector<1x8x8xf32>, vector<1x8x8xf32>, vector<1x8x8xf32> -> vector<1x8x8xf32>
    "tpu.trace_stop"() : () -> ()
    %cst_22 = arith.constant 0.353553385 : f32
    %73 = vector.broadcast %cst_22 : f32 to vector<1x8x8xf32>
    %74 = arith.mulf %72, %73 : vector<1x8x8xf32>
    %cst_23 = arith.constant dense<0xFF800000> : vector<1x8xf32>
    %75 = vector.multi_reduction <maximumf>, %74, %cst_23 [2] : vector<1x8x8xf32> to vector<1x8xf32>
    %76 = vector.shape_cast %75 : vector<1x8xf32> to vector<1x8x1xf32>
    %77 = vector.broadcast %76 : vector<1x8x1xf32> to vector<1x8x8xf32>
    %78 = arith.subf %74, %77 : vector<1x8x8xf32>
    %79 = math.exp %78 : vector<1x8x8xf32>
    %cst_24 = arith.constant dense<0.000000e+00> : vector<1x8xf32>
    %80 = vector.multi_reduction <add>, %79, %cst_24 [2] : vector<1x8x8xf32> to vector<1x8xf32>
    %81 = vector.shape_cast %80 : vector<1x8xf32> to vector<1x8x1xf32>
    %82 = tpu.reciprocal %81 {approx = true} : vector<1x8x1xf32> -> vector<1x8x1xf32>
    %83 = vector.broadcast %82 : vector<1x8x1xf32> to vector<1x8x8xf32>
    %84 = arith.mulf %79, %83 : vector<1x8x8xf32>
    "tpu.trace_start"() <{level = 10 : i32, message = "bqk,bkd->bqd"}> : () -> ()
    %cst_25 = arith.constant dense<0.000000e+00> : vector<1x8x8xf32>
    %85 = tpu.matmul %84, %71, %cst_25 {dimension_numbers = #tpu.dot_dimension_numbers<[2], [1], [1], [2], [0, 0, 0, 1, 1, 2], [0], [0]>} : vector<1x8x8xf32>, vector<1x8x8xf32>, vector<1x8x8xf32> -> vector<1x8x8xf32>
    "tpu.trace_stop"() : () -> ()
    %86 = vector.shape_cast %85 : vector<1x8x8xf32> to vector<8x8xf32>
    %87 = vector.extract_strided_slice %23 {offsets = [0, 24], sizes = [8, 8], strides = [1, 1]} : vector<8x96xf32> to vector<8x8xf32>
    %88 = vector.shape_cast %87 : vector<8x8xf32> to vector<1x8x8xf32>
    %89 = vector.extract_strided_slice %23 {offsets = [0, 56], sizes = [8, 8], strides = [1, 1]} : vector<8x96xf32> to vector<8x8xf32>
    %90 = vector.shape_cast %89 : vector<8x8xf32> to vector<1x8x8xf32>
    %91 = vector.extract_strided_slice %23 {offsets = [0, 88], sizes = [8, 8], strides = [1, 1]} : vector<8x96xf32> to vector<8x8xf32>
    %92 = vector.shape_cast %91 : vector<8x8xf32> to vector<1x8x8xf32>
    "tpu.trace_start"() <{level = 10 : i32, message = "bqd,bkd->bqk"}> : () -> ()
    %cst_26 = arith.constant dense<0.000000e+00> : vector<1x8x8xf32>
    %93 = tpu.matmul %88, %90, %cst_26 {dimension_numbers = #tpu.dot_dimension_numbers<[2], [2], [1], [1], [0, 0, 0, 1, 1, 1], [0], [0]>} : vector<1x8x8xf32>, vector<1x8x8xf32>, vector<1x8x8xf32> -> vector<1x8x8xf32>
    "tpu.trace_stop"() : () -> ()
    %cst_27 = arith.constant 0.353553385 : f32
    %94 = vector.broadcast %cst_27 : f32 to vector<1x8x8xf32>
    %95 = arith.mulf %93, %94 : vector<1x8x8xf32>
    %cst_28 = arith.constant dense<0xFF800000> : vector<1x8xf32>
    %96 = vector.multi_reduction <maximumf>, %95, %cst_28 [2] : vector<1x8x8xf32> to vector<1x8xf32>
    %97 = vector.shape_cast %96 : vector<1x8xf32> to vector<1x8x1xf32>
    %98 = vector.broadcast %97 : vector<1x8x1xf32> to vector<1x8x8xf32>
    %99 = arith.subf %95, %98 : vector<1x8x8xf32>
    %100 = math.exp %99 : vector<1x8x8xf32>
    %cst_29 = arith.constant dense<0.000000e+00> : vector<1x8xf32>
    %101 = vector.multi_reduction <add>, %100, %cst_29 [2] : vector<1x8x8xf32> to vector<1x8xf32>
    %102 = vector.shape_cast %101 : vector<1x8xf32> to vector<1x8x1xf32>
    %103 = tpu.reciprocal %102 {approx = true} : vector<1x8x1xf32> -> vector<1x8x1xf32>
    %104 = vector.broadcast %103 : vector<1x8x1xf32> to vector<1x8x8xf32>
    %105 = arith.mulf %100, %104 : vector<1x8x8xf32>
    "tpu.trace_start"() <{level = 10 : i32, message = "bqk,bkd->bqd"}> : () -> ()
    %cst_30 = arith.constant dense<0.000000e+00> : vector<1x8x8xf32>
    %106 = tpu.matmul %105, %92, %cst_30 {dimension_numbers = #tpu.dot_dimension_numbers<[2], [1], [1], [2], [0, 0, 0, 1, 1, 2], [0], [0]>} : vector<1x8x8xf32>, vector<1x8x8xf32>, vector<1x8x8xf32> -> vector<1x8x8xf32>
    "tpu.trace_stop"() : () -> ()
    %107 = vector.shape_cast %106 : vector<1x8x8xf32> to vector<8x8xf32>
    %108 = tpu.concatenate %44, %65, %86, %107 in 1 : vector<8x8xf32>, vector<8x8xf32>, vector<8x8xf32>, vector<8x8xf32> -> vector<8x32xf32>
    %c0_31 = arith.constant 0 : index
    %c0_32 = arith.constant 0 : index
    %c0_33 = arith.constant 0 : index
    %109 = vector.load %arg4[%c0_31, %c0_32, %c0_33] : memref<2x32x32xf32, #tpu.memory_space<vmem>>, vector<1x32x32xf32>
    %110 = vector.shape_cast %109 : vector<1x32x32xf32> to vector<32x32xf32>
    %cst_34 = arith.constant dense<0.000000e+00> : vector<8x32xf32>
    %111 = tpu.matmul %108, %110, %cst_34 {dimension_numbers = #tpu.dot_dimension_numbers<[1], [0], [0], [1], [0, 0, 1, 1], [], []>} : vector<8x32xf32>, vector<32x32xf32>, vector<8x32xf32> -> vector<8x32xf32>
    %c0_35 = arith.constant 0 : index
    %c0_36 = arith.constant 0 : index
    %c0_37 = arith.constant 0 : index
    %112 = vector.load %arg5[%c0_35, %c0_36, %c0_37] : memref<2x1x32xf32, #tpu.memory_space<vmem>>, vector<1x1x32xf32>
    %113 = vector.shape_cast %112 : vector<1x1x32xf32> to vector<1x32xf32>
    %114 = vector.broadcast %113 : vector<1x32xf32> to vector<8x32xf32>
    %115 = arith.addf %111, %114 : vector<8x32xf32>
    %116 = arith.addf %1, %115 : vector<8x32xf32>
    %cst_38 = arith.constant dense<0.000000e+00> : vector<8xf32>
    %117 = vector.multi_reduction <add>, %116, %cst_38 [1] : vector<8x32xf32> to vector<8xf32>
    %118 = vector.shape_cast %117 : vector<8xf32> to vector<8x1xf32>
    %cst_39 = arith.constant 3.200000e+01 : f32
    %119 = vector.broadcast %cst_39 : f32 to vector<8x1xf32>
    %120 = arith.divf %118, %119 : vector<8x1xf32>
    %121 = vector.broadcast %120 : vector<8x1xf32> to vector<8x32xf32>
    %122 = arith.subf %116, %121 : vector<8x32xf32>
    %123 = arith.mulf %122, %122 : vector<8x32xf32>
    %cst_40 = arith.constant dense<0.000000e+00> : vector<8xf32>
    %124 = vector.multi_reduction <add>, %123, %cst_40 [1] : vector<8x32xf32> to vector<8xf32>
    %125 = vector.shape_cast %124 : vector<8xf32> to vector<8x1xf32>
    %cst_41 = arith.constant 0.0322580636 : f32
    %126 = vector.broadcast %cst_41 : f32 to vector<8x1xf32>
    %127 = arith.mulf %125, %126 : vector<8x1xf32>
    %128 = math.sqrt %127 : vector<8x1xf32>
    %cst_42 = arith.constant 9.99999997E-7 : f32
    %129 = vector.broadcast %cst_42 : f32 to vector<8x1xf32>
    %130 = arith.addf %128, %129 : vector<8x1xf32>
    %131 = tpu.reciprocal %130 : vector<8x1xf32> -> vector<8x1xf32>
    %132 = vector.broadcast %131 : vector<8x1xf32> to vector<8x32xf32>
    %133 = arith.mulf %122, %132 : vector<8x32xf32>
    %c1 = arith.constant 1 : index
    %c0_43 = arith.constant 0 : index
    %c0_44 = arith.constant 0 : index
    %134 = vector.load %arg4[%c1, %c0_43, %c0_44] : memref<2x32x32xf32, #tpu.memory_space<vmem>>, vector<1x32x32xf32>
    %135 = vector.shape_cast %134 : vector<1x32x32xf32> to vector<32x32xf32>
    %cst_45 = arith.constant dense<0.000000e+00> : vector<8x32xf32>
    %136 = tpu.matmul %133, %135, %cst_45 {dimension_numbers = #tpu.dot_dimension_numbers<[1], [0], [0], [1], [0, 0, 1, 1], [], []>} : vector<8x32xf32>, vector<32x32xf32>, vector<8x32xf32> -> vector<8x32xf32>
    %137 = arith.addf %116, %136 : vector<8x32xf32>
    %c1_46 = arith.constant 1 : index
    %c0_47 = arith.constant 0 : index
    %c0_48 = arith.constant 0 : index
    %138 = vector.load %arg5[%c1_46, %c0_47, %c0_48] : memref<2x1x32xf32, #tpu.memory_space<vmem>>, vector<1x1x32xf32>
    %139 = vector.shape_cast %138 : vector<1x1x32xf32> to vector<1x32xf32>
    %140 = vector.broadcast %139 : vector<1x32xf32> to vector<8x32xf32>
    %141 = arith.addf %137, %140 : vector<8x32xf32>
    %142 = vector.shape_cast %141 : vector<8x32xf32> to vector<1x8x32xf32>
    %c0_49 = arith.constant 0 : index
    %c0_50 = arith.constant 0 : index
    %c0_51 = arith.constant 0 : index
    %143 = vector.load %arg6[%c0_49, %c0_50, %c0_51] : memref<1x8x32xf32, #tpu.memory_space<vmem>>, vector<1x8x32xf32>
    tpu.vector_store %arg6[%c0_49, %c0_50, %c0_51], %142 {strides = array<i32>} : memref<1x8x32xf32, #tpu.memory_space<vmem>>, vector<1x8x32xf32>,
    return
  }
  func.func @transform_0(%arg0: i32) -> (i32, i32, i32) {
    %c0_i32 = arith.constant 0 : i32
    %c0_i32_0 = arith.constant 0 : i32
    %c0_i32_1 = arith.constant 0 : i32
    return %arg0, %c0_i32, %c0_i32_0 : i32, i32, i32
  }
  func.func @transform_1(%arg0: i32) -> (i32, i32) {
    %c0_i32 = arith.constant 0 : i32
    %c0_i32_0 = arith.constant 0 : i32
    %c0_i32_1 = arith.constant 0 : i32
    return %c0_i32, %c0_i32_0 : i32, i32
  }
  func.func @transform_2(%arg0: i32) -> (i32, i32) {
    %c0_i32 = arith.constant 0 : i32
    %c0_i32_0 = arith.constant 0 : i32
    %c0_i32_1 = arith.constant 0 : i32
    return %c0_i32, %c0_i32_0 : i32, i32
  }
  func.func @transform_3(%arg0: i32) -> (i32, i32, i32) {
    %c0_i32 = arith.constant 0 : i32
    %c0_i32_0 = arith.constant 0 : i32
    %c0_i32_1 = arith.constant 0 : i32
    %c0_i32_2 = arith.constant 0 : i32
    return %c0_i32, %c0_i32_0, %c0_i32_1 : i32, i32, i32
  }
  func.func @transform_4(%arg0: i32) -> (i32, i32, i32) {
    %c0_i32 = arith.constant 0 : i32
    %c0_i32_0 = arith.constant 0 : i32
    %c0_i32_1 = arith.constant 0 : i32
    %c0_i32_2 = arith.constant 0 : i32
    return %c0_i32, %c0_i32_0, %c0_i32_1 : i32, i32, i32
  }
  func.func @transform_5(%arg0: i32) -> (i32, i32, i32) {
    %c0_i32 = arith.constant 0 : i32
    %c0_i32_0 = arith.constant 0 : i32
    %c0_i32_1 = arith.constant 0 : i32
    return %arg0, %c0_i32, %c0_i32_0 : i32, i32, i32
  }
}

</mosaic_0001>

<bundles_post_ra>
// kernel: tpu_custom_call.1
= control target key start
LH: loop header
LB: loop body
LE: loop exit
PB: predicated region body
PF: predicated region fallthrough
CT: control target
= control target key end

     0   :  { %10 = vsyncpa [#allocation3], 0  ;;  %s1411_s0 = inlined_call_operand.hbm [shape: f32[2,8,32], index: 0, kind: input, shape index: {}]   ;;  %s1412_s1 = inlined_call_operand.hbm [shape: f32[32,96], index: 1, kind: input, shape index: {}]   ;;  %s1413_s2 = inlined_call_operand.vmem [shape: f32[1,96], index: 2, kind: input, shape index: {}]   ;;  %s1414_s3 = inlined_call_operand.hbm [shape: f32[2,32,32], index: 3, kind: input, shape index: {}]   ;;  %s1415_s4 = inlined_call_operand.vmem [shape: f32[2,1,32], index: 4, kind: input, shape index: {}]   ;;  %s1416_s5 = inlined_call_operand.hbm [shape: f32[2,8,32], index: 5, kind: output, shape index: {}]  }
   0x1   :  { %12 = vsyncpa [#allocation3 + $0x1], 0 }
   0x2   :  { %13 = vsyncpa [#allocation6], 0 }
   0x3   :  { %14 = vsyncpa [#allocation4], 0 }
   0x4   :  { %16 = vsyncpa [#allocation4 + $0x1], 0  ;;  %s1201_s18 = smov 0   ;;  %s1203_s19 = smov 0  }
   0x5   :  { %s1205_s20 = smov 0   ;;  %s1207_s21 = smov 0  }
   0x6 LB: > { %s174_s24 = sshll.u32 %s1412_s1, 4  ;;  %s1225_s25 = sadd.s32 4294967295, %s1150_s21   ;;  %s1150_s21 = sphi %s1207_s21, %s1427_s21   ;;  %s1146_s20 = sphi %s1205_s20, %s1426_s20   ;;  %s1142_s19 = sphi %s1203_s19, %s1425_s19   ;;  %s1138_s18 = sphi %s1201_s18, %s1424_s18   ;;  %s175_s24 = int_to_ptr.hbm [resolvable:$true] %s174_s24 }
   0x7   : > { %p846_p0 = scmp.ge.s32.totalorder %s1150_s21, 1  ;;  %p43_p1 = scmp.eq.s32.totalorder %s1225_s25, 0 }
   0x8   : > { %p163_p2 = scmp.lt.s32.totalorder %s1150_s21, 3  ;;  %s1152_s27 = smov [#allocation5]  }
   0x9   : > { %s176_s28 = sshll.u32 %s1152_s27, 4  ;;  %s191_s6 = sshll.u32 %s1414_s3, 4  ;;  %s177_s28 = int_to_ptr.vmem [resolvable:$true] %s176_s28  ;;  %s192_s6 = int_to_ptr.hbm [resolvable:$true] %s191_s6 }
   0xa   : > { %p1230_p3 = pnand %p846_p0, %p163_p2  ;;  %s1153_s7 = smov [#allocation7]  }
   0xb   : > { %s193_s8 = sshll.u32 %s1153_s7, 4  ;;  %s1154_s9 = smov 128   ;;  %s194_s8 = int_to_ptr.vmem [resolvable:$true] %s193_s8 }
   0xc   : > { %p889_p4 = pneg %p1230_p3  ;;  %s1155_s10 = smov 8  }
   0xd   : > { %s845_s11 = sadd.s32 4294967294, %s1150_s21   ;;  %s1244_s12 = sadd.s32 1, %s1150_s21  }
   0xe   : > { %p890_p6 = pnand %p889_p4, %p43_p1  ;;  %s26_s13 = ssub.s32 %s1150_s21, %s1244_s12 }
   0xf   : > { %s29_s14 = sadd.s32 1, %s1146_s20  ;;  %p27_p7 = scmp.eq.s32.totalorder %s26_s13, 0 }
  0x10   : > { %892 = dma.hbm_to_vmem [thread:$0]  (!%p890_p6), %s175_s24, 512, %s177_s28, [#allocation6], %s1154_s9, %s1154_s9, %s1155_s10  }
  0x11   : > { %895 = dma.hbm_to_vmem [thread:$0]  (!%p890_p6), %s192_s6, 1024, %s194_s8, [#allocation6], %s1154_s9, %s1154_s9, %s1155_s10  }
  0x12   : > { %p36_p8 = scmp.ne.s32.totalorder %s1146_s20, %s1142_s19  ;;  %p37_p9 = scmp.eq.s32.totalorder %s1150_s21, 0 }
  0x13   : > { %p42_p10 = scmp.ne.s32.totalorder %s1142_s19, %s1138_s18  ;;  %p150_p13 = scmp.eq.s32.totalorder %s1225_s25, 1 }
  0x14   : > { %s1255_s15 = scalar_select %p27_p7, %s1146_s20, %s29_s14  }
  0x15   : > { %p1257_p11 = por %p37_p9, %p36_p8  ;;  %p1263_p12 = por %p43_p1, %p42_p10 }
  0x16   : > { %p156_p0 = scmp.eq.s32.totalorder %s845_s11, 1  ;;  %p906_p2 = scmp.lt.s32.totalorder %s1150_s21, 2 }
  0x17   : > { %s210_s22 = sand.u32 1, %s1146_s20   ;;  %p1270_p4 = por %p150_p13, %p36_p8 }
  0x18   : > { %p1274_p6 = por %p156_p0, %p42_p10  ;;  %s850_s27 = sshll.u32 %s210_s22, 3 }
  0x19   : > { %s851_s28 = sshll.u32 %s1150_s21, 3  ;;  %s214_s7 = scalar_lea.vmem [#allocation2], %s850_s27 }
  0x1a   : > { %s218_s6 = scalar_lea.hbm %s1411_s0, %s851_s28  ;;  %s222_s8 = sshll.u32 %s214_s7, 4  ;;  %s223_s8 = int_to_ptr.vmem [resolvable:$true] %s222_s8 }
  0x1b   : > { %s220_s9 = sshll.u32 %s218_s6, 4  ;;  %p1284_p7 = pnand %p906_p2, %p1257_p11  ;;  %s221_s9 = int_to_ptr.hbm [resolvable:$true] %s220_s9 }
  0x1c   : > { %s211_s11 = scalar_lea.sflag [#allocation3], %s210_s22  ;;  %s1050_s13 = sshra.s32 %s221_s9, 4  ;;  %s1051_s13 = int_to_ptr.hbm [resolvable:$true] %s1050_s13 }
  0x1d   : > { %s1052_s14 = scalar_lea.hbm %s1051_s13, 8  ;;  %p1054_p9 = pneg %p1284_p7 }
  0x1e   : > { %p1053_p8 = scmp.ne.s32.totalorder %s1051_s13, %s1052_s14  ;;  %s1057_s29 = scalar_lea.hbm %s1411_s0, 16 }
  0x1f   : > { %p1058_p11 = scmp.lt.s32.totalorder %s1051_s13, %s1411_s0  ;;  %p1059_p0 = scmp.lt.s32.totalorder %s1057_s29, %s1052_s14 }
  0x20   : > { %p1055_p10 = pnand %p1054_p9, %p1053_p8 }
  0x21   : > { %p1060_p2 = por %p1059_p0, %p1058_p11 }
  0x22   : > { %p1056_p13 = pneg %p1055_p10 }
  0x24   : > { %p1061_p5 = pnand %p1060_p2, %p1056_p13 }
  0x26   : > { %1064 = shalt.err (!%p1061_p5)
}
  0x27   : > { %899 = dma.hbm_to_vmem [thread:$0]  (!%p1284_p7), %s221_s9, 128, %s223_s8, %s211_s11  }
  0x28   : > { %231 = sbr.rel (%p1230_p3) target bundleno = 1795 (0x703), region = 40  ;;  %s1301_s22 = sand.u32 (!%p1230_p3), 1, %s1142_s19  }
  0x29   : > { %s853_s6 = sshll.u32 (!%p1230_p3), %s1301_s22, 3  ;;  %s234_s7 = scalar_lea.sflag (!%p1230_p3), [#allocation3], %s1301_s22 }
  0x2a   : > { %s237_s13 = scalar_lea.vmem (!%p1230_p3), [#allocation2], %s853_s6 }
  0x2d   : > { %1125 = dma.done.wait (%p1263_p12), %s234_s7, 128  }
  0x2e   : > { %1127 = vsyncadd (%p1263_p12), %s234_s7, 4294967168 }
  0x2f   : > { %1129 = dma.done.wait (%p43_p1), [#allocation6], 1536  }
  0x30   : > { %1131 = vsyncadd (%p43_p1), [#allocation6], 4294965760  ;;  %vm276_vm0 = vcmask 261120   ;;  %v1315_v0 = vld [vmem:[%s237_s13] sm:$0xff]  ;;  %v1156_v2 = vmov 32.0   ;;  %v323_v16 = vld [vmem:[#allocation5 + $0x8] sm:$0xff] }
  0x31   : > { %v277_v1 = vsel %vm276_vm0, %v1315_v0, 0.0  ;;  %964 = vrcp.f32 %v1156_v2  ;;  %v325_v14 = vld [vmem:[#allocation5 + $0x18] sm:$0xff]  ;;  %v324_v15 = vld [vmem:[#allocation5 + $0x10] sm:$0xff]  ;;  %v322_v17 = vld [vmem:[#allocation5] sm:$0xff]  ;;  %s1157_s8 = smov 72   ;;  %s1158_s9 = smov 120  }
  0x32   : > { %278 = vadd.xlane.f32.xlu0 %v277_v1  ;;  %345 = vmatpush.msra.mxu0 %v325_v14  ;;  %v961_v42 = vld [vmem:[%s1413_s2] ss:$0 sm:$0xff]  ;;  %s1159_s10 = smov 96   ;;  %s1160_s11 = smov 80   ;;  %vm356_vm8 = vcmask 64512   ;;  %vm630_vm9 = vcmask 130048  }
  0x33   : > { %s1161_s14 = smov 88   ;;  %s1162_s27 = smov 104   ;;  %vm632_vm10 = vcmask 195584  }
  0x34   : > { %346 = vmatpush.msra.mxu0 %v324_v15  ;;  %s1163_s28 = smov 112   ;;  %s1164_s29 = smov 64  }
  0x35   : > { %s1165_s30 = smov 40   ;;  %s1166_s16 = smov 56  }
  0x36   : > { %347 = vmatpush.msra.mxu0 %v323_v16  ;;  %s1167_s7 = smov 48   ;;  %s1168_s13 = smov 16  }
  0x37   : > { %v965_v3 = vpop.eup %964  ;;  %s1169_s26 = smov 8   ;;  %s1170_s17 = smov 24  }
  0x38   : > { %v281_v4 = vmul.f32 32.0, %v965_v3  ;;  %vm285_vm1 = vweird.f32 %v965_v3  ;;  %348 = vmatpush.msra.mxu0 %v322_v17 }
  0x3a   : > { %v282_v5 = vsub.f32 1.0, %v281_v4 }
  0x3c   : > { %v283_v6 = vmul.f32 %v965_v3, %v282_v5 }
  0x3e   : > { %v284_v7 = vadd.f32 %v965_v3, %v283_v6 }
  0x40   : > { %v1319_v8 = vsel %vm285_vm1, %v965_v3, %v284_v7 }
  0xa5   : > { %v279_v9 = vpop.xlane.xlu0 %278 }
  0xa6   : > { %v287_v10 = vmul.f32 %v1319_v8, %v279_v9 }
  0xa8   : > { %v288_v11 = vsub.f32 %v1315_v0, %v287_v10 }
  0xaa   : > { %v289_v12 = vmul.f32 %v288_v11, %v288_v11 }
  0xac   : > { %v290_v13 = vsel %vm276_vm0, %v289_v12, 0.0 }
  0xad   : > { %291 = vadd.xlane.f32.xlu0 %v290_v13 }
 0x120   : > { %v292_v18 = vpop.xlane.xlu0 %291 }
 0x121   : > { %v293_v19 = vmul.f32 0.032258064, %v292_v18 }
 0x123   : > { %966 = vrsqrt.f32 %v293_v19  ;;  %vm301_vm2 = vcmp.eq.f32.partialorder %v293_v19, inf  ;;  %v304_v27 = vand.u32 2147483648, %v293_v19  ;;  %vm303_vm3 = vcmp.eq.f32.partialorder %v293_v19, 0.0 }
 0x129   : > { %v967_v20 = vpop.eup %966 }
 0x12a   : > { %v295_v21 = vmul.f32 %v967_v20, %v293_v19 }
 0x12c   : > { %v296_v22 = vmul.f32 %v967_v20, %v295_v21 }
 0x12e   : > { %v297_v23 = vmul.f32 0.5, %v296_v22 }
 0x130   : > { %v298_v24 = vsub.f32 1.5, %v297_v23 }
 0x132   : > { %v299_v25 = vmul.f32 %v967_v20, %v298_v24 }
 0x134   : > { %v300_v26 = vmul.f32 %v299_v25, %v293_v19 }
 0x136   : > { %v302_v28 = vsel %vm301_vm2, %v293_v19, %v300_v26 }
 0x137   : > { %v305_v29 = vsel %vm303_vm3, %v304_v27, %v302_v28 }
 0x138   : > { %v306_v30 = vadd.f32 1e-06, %v305_v29 }
 0x13a   : > { %968 = vrcp.f32 %v306_v30  ;;  %v318_v34 = vand.u32 2147483648, %v306_v30  ;;  %v316_v36 = vand.u32 2147483647, %v306_v30  ;;  %vm312_vm5 = vweird.f32 %v306_v30 }
 0x13c   : > { %v319_v38 = vor.u32 1.1754944e-38, %v318_v34  ;;  %vm317_vm7 = vcmp.eq.f32.partialorder %v316_v36, 8.507059e+37 }
 0x140   : > { %v969_v31 = vpop.eup %968 }
 0x141   : > { %v308_v32 = vmul.f32 %v969_v31, %v306_v30  ;;  %vm313_vm4 = vweird.f32 %v969_v31 }
 0x142   : > { %vm314_vm6 = vmor %vm312_vm5, %vm313_vm4 }
 0x143   : > { %v309_v33 = vsub.f32 1.0, %v308_v32 }
 0x145   : > { %v310_v35 = vmul.f32 %v969_v31, %v309_v33 }
 0x147   : > { %v311_v37 = vadd.f32 %v969_v31, %v310_v35 }
 0x149   : > { %v315_v39 = vsel %vm314_vm6, %v969_v31, %v311_v37 }
 0x14a   : > { %v320_v40 = vsel %vm317_vm7, %v319_v38, %v315_v39 }
 0x14b   : > { %v321_v41 = vmul.f32 %v320_v40, %v288_v11 }
 0x14d   : > { %857 = vmatmul.msk.f32.vlgmr.msra.gmra.mxu0 %vm276_vm0, %v321_v41 }
 0x1ca   : > { %v350_v43 = vpop.f32.mrf.mxu0 }
 0x1cb   : > { %v1328_v44 = vadd.f32 %v961_v42, %v350_v43  ;;  %v637_v42 = vld [vmem:[#allocation7 + $0x18] sm:$0xff]  ;;  %v636_v43 = vld [vmem:[#allocation7 + $0x10] sm:$0xff] }
 0x1cd   : > { %553 = vrot.lane.b32.xlu0 %v1328_v44, %s1157_s8  ;;  %419 = vrot.lane.b32.xlu2 %v1328_v44, %s1158_s9 }
 0x1ce   : > { %354 = vrot.lane.b32.xlu1 %v1328_v44, %s1159_s10  ;;  %s874_s10 = sshll.u32 %s1225_s25, 3  ;;  %s741_s25 = scalar_lea.sflag [#allocation4], %s1301_s22 }
 0x1d5   : > { %487 = vrot.lane.b32.xlu2 %v1328_v44, %s1160_s11 }
 0x1d6   : > { %421 = vrot.lane.b32.xlu1 %v1328_v44, %s1161_s14 }
 0x1dd   : > { %551 = vrot.lane.b32.xlu2 %v1328_v44, %s1162_s27  ;;  %s751_s27 = scalar_lea.hbm %s1416_s5, %s874_s10 }
 0x1de   : > { %485 = vrot.lane.b32.xlu1 %v1328_v44, %s1163_s28 }
 0x227   : > { %v420_v45 = vpop.permute.xlu2 %419 }
 0x22f   : > { %v488_v46 = vpop.permute.xlu2 %487 }
 0x237   : > { %v552_v49 = vpop.permute.xlu2 %551 }
 0x23f   : > { %v554_v47 = vpop.permute.xlu0 %553 }
 0x240   : > { %v355_v48 = vpop.permute.xlu1 %354  ;;  %867 = vmatpush.xpose.msk.msrb.mxu0 %vm356_vm8, %v554_v47 }
 0x241   : > { %858 = vmatpush.xpose.msk.msra.mxu1 %vm356_vm8, %v355_v48 }
 0x243   : > { %868 = vmatmul.msk.f32.vlgmr.msrb.gmra.mxu0 %vm356_vm8, %v552_v49 }
 0x244   : > { %859 = vmatmul.msk.f32.vlgmr.msra.gmra.mxu1 %vm356_vm8, %v1328_v44 }
 0x245   : > { %864 = vmatpush.xpose.msk.msrb.mxu1 %vm356_vm8, %v488_v46 }
 0x248   : > { %v422_v50 = vpop.permute.xlu1 %421 }
 0x249   : > { %861 = vmatpush.xpose.msk.msra.mxu3 %vm356_vm8, %v422_v50  ;;  %657 = vmatpush.msra.mxu1 %v637_v42 }
 0x24b   : > { %658 = vmatpush.msra.mxu1 %v636_v43 }
 0x24c   : > { %862 = vmatmul.msk.f32.vlgmr.msra.gmra.mxu3 %vm356_vm8, %v420_v45  ;;  %v634_v45 = vld [vmem:[#allocation7] sm:$0xff] }
 0x250   : > { %v486_v51 = vpop.permute.xlu1 %485 }
 0x251   : > { %865 = vmatmul.msk.f32.vlgmr.msrb.gmra.mxu1 %vm356_vm8, %v486_v51 }
 0x2c0   : > { %v576_v61 = vpop.f32.mrf.mxu0 }
 0x2c1   : > { %v378_v52 = vpop.f32.mrf.mxu1  ;;  %v579_v62 = vmul.f32 0.35355338, %v576_v61 }
 0x2c2   : > { %v381_v53 = vmul.f32 0.35355338, %v378_v52  ;;  %v962_v52 = vld [vmem:[%s1415_s4] ss:$0 sm:$0xff] }
 0x2c3   : > { %v580_v63 = vsel %vm356_vm8, %v579_v62, -inf }
 0x2c4   : > { %v382_v54 = vsel %vm356_vm8, %v381_v53, -inf }
 0x2c5   : > { %383 = vmax.xlane.f32.xlu1 %v382_v54 }
 0x2ce   : > { %v510_v55 = vpop.f32.mrf.mxu1 }
 0x2cf   : > { %v513_v56 = vmul.f32 0.35355338, %v510_v55  ;;  %v444_v57 = vpop.f32.mrf.mxu3 }
 0x2d0   : > { %v447_v58 = vmul.f32 0.35355338, %v444_v57 }
 0x2d1   : > { %v514_v59 = vsel %vm356_vm8, %v513_v56, -inf }
 0x2d2   : > { %515 = vmax.xlane.f32.xlu0 %v514_v59  ;;  %v448_v60 = vsel %vm356_vm8, %v447_v58, -inf }
 0x2d3   : > { %449 = vmax.xlane.f32.xlu2 %v448_v60 }
 0x2db   : > { %581 = vmax.xlane.f32.xlu2 %v580_v63  ;;  %v707_v63 = vld [vmem:[#allocation7 + $0x30] sm:$0xff] }
 0x2de   : > { %393 = vrot.lane.b32.xlu1 %v1328_v44, %s1164_s29 }
 0x338   : > { %v384_v1 = vpop.xlane.xlu1 %383 }
 0x339   : > { %v385_v2 = vsub.f32 %v381_v53, %v384_v1  ;;  %v706_v1 = vld [vmem:[#allocation7 + $0x28] sm:$0xff] }
 0x33b   : > { %v386_v3 = vmul.f32 1.442695, %v385_v2  ;;  %v705_v2 = vld [vmem:[#allocation7 + $0x20] sm:$0xff] }
 0x33d   : > { %970 = vpow2.f32 %v386_v3 }
 0x343   : > { %v971_v4 = vpop.eup %970 }
 0x344   : > { %v388_v5 = vsel %vm356_vm8, %v971_v4, 0.0 }
 0x345   : > { %v516_v6 = vpop.xlane.xlu0 %515  ;;  %389 = vadd.xlane.f32.xlu1 %v388_v5 }
 0x346   : > { %v517_v7 = vsub.f32 %v513_v56, %v516_v6  ;;  %v450_v9 = vpop.xlane.xlu2 %449 }
 0x347   : > { %v451_v15 = vsub.f32 %v447_v58, %v450_v9 }
 0x348   : > { %v518_v10 = vmul.f32 1.442695, %v517_v7 }
 0x349   : > { %v452_v18 = vmul.f32 1.442695, %v451_v15 }
 0x34a   : > { %972 = vpow2.f32 %v518_v10 }
 0x34e   : > { %v582_v11 = vpop.xlane.xlu2 %581 }
 0x34f   : > { %v583_v12 = vsub.f32 %v579_v62, %v582_v11  ;;  %v708_v62 = vld [vmem:[#allocation7 + $0x38] sm:$0xff] }
 0x350   : > { %v973_v13 = vpop.eup %972  ;;  %v394_v14 = vpop.permute.xlu1 %393 }
 0x351   : > { %v584_v16 = vmul.f32 1.442695, %v583_v12  ;;  %414 = vmatpush.msra.mxu2 %v394_v14  ;;  %v520_v17 = vsel %vm356_vm8, %v973_v13, 0.0 }
 0x352   : > { %521 = vadd.xlane.f32.xlu0 %v520_v17 }
 0x353   : > { %974 = vpow2.f32 %v584_v16 }
 0x354   : > { %976 = vpow2.f32 %v452_v18 }
 0x359   : > { %v975_v19 = vpop.eup %974 }
 0x35a   : > { %v586_v20 = vsel %vm356_vm8, %v975_v19, 0.0  ;;  %v977_v21 = vpop.eup %976 }
 0x35b   : > { %587 = vadd.xlane.f32.xlu2 %v586_v20  ;;  %v454_v22 = vsel %vm356_vm8, %v977_v21, 0.0 }
 0x35e   : > { %591 = vrot.lane.b32.xlu1 %v1328_v44, %s1165_s30  ;;  %s274_s30 = scalar_lea.vmem [#allocation8], %s853_s6  ;;  %s1100_s6 = scalar_lea.hbm %s1416_s5, 16 }
 0x363   : > { %455 = vadd.xlane.f32.xlu2 %v454_v22 }
 0x366   : > { %459 = vrot.lane.b32.xlu0 %v1328_v44, %s1166_s16  ;;  %s753_s16 = sshll.u32 %s274_s30, 4  ;;  %s754_s16 = int_to_ptr.vmem [resolvable:$true] %s753_s16 }
 0x37b   : > { %525 = vrot.lane.b32.xlu2 %v1328_v44, %s1167_s7  ;;  %v635_v44 = vld [vmem:[#allocation7 + $0x8] sm:$0xff]  ;;  %s755_s7 = sshll.u32 %s751_s27, 4  ;;  %s756_s7 = int_to_ptr.hbm [resolvable:$true] %s755_s7 }
 0x37c   : > { %659 = vmatpush.msra.mxu1 %v635_v44 }
 0x37e   : > { %660 = vmatpush.msra.mxu1 %v634_v45 }
 0x3b8   : > { %v390_v23 = vpop.xlane.xlu1 %389 }
 0x3b9   : > { %978 = vrcp.f32 %v390_v23 }
 0x3bf   : > { %v979_v24 = vpop.eup %978 }
 0x3c0   : > { %v392_v25 = vmul.f32 %v979_v24, %v971_v4 }
 0x3c2   : > { %860 = vmatmul.msk.f32.vlgmr.msra.gmra.mxu2 %vm356_vm8, %v392_v25 }
 0x3c5   : > { %v522_v27 = vpop.xlane.xlu0 %521 }
 0x3c6   : > { %980 = vrcp.f32 %v522_v27 }
 0x3cc   : > { %v981_v31 = vpop.eup %980 }
 0x3cd   : > { %v524_v35 = vmul.f32 %v981_v31, %v973_v13 }
 0x3ce   : > { %v588_v26 = vpop.xlane.xlu2 %587 }
 0x3d0   : > { %v592_v30 = vpop.permute.xlu1 %591 }
 0x3d6   : > { %v456_v28 = vpop.xlane.xlu2 %455 }
 0x3d7   : > { %982 = vrcp.f32 %v456_v28 }
 0x3d8   : > { %v460_v29 = vpop.permute.xlu0 %459  ;;  %984 = vrcp.f32 %v588_v26  ;;  %v963_v26 = vld [vmem:[%s1415_s4 + $0x1] ss:$0 sm:$0xff] }
 0x3d9   : > { %480 = vmatpush.msrb.mxu2 %v460_v29 }
 0x3db   : > { %612 = vmatpush.msra.mxu2 %v592_v30 }
 0x3dd   : > { %v983_v32 = vpop.eup %982 }
 0x3de   : > { %v526_v33 = vpop.permute.xlu2 %525  ;;  %v458_v34 = vmul.f32 %v983_v32, %v977_v21  ;;  %v985_v36 = vpop.eup %984 }
 0x3df   : > { %546 = vmatpush.msrb.mxu3 %v526_v33  ;;  %v590_v37 = vmul.f32 %v985_v36, %v975_v19 }
 0x3e0   : > { %863 = vmatmul.msk.f32.vlgmr.msrb.gmra.mxu2 %vm356_vm8, %v458_v34  ;;  %866 = vmatmul.msk.f32.vlgmr.msrb.gmra.mxu3 %vm356_vm8, %v524_v35 }
 0x3e1   : > { %724 = vmatpush.msra.mxu3 %v708_v62 }
 0x3e3   : > { %725 = vmatpush.msra.mxu3 %v707_v63 }
 0x3e5   : > { %726 = vmatpush.msra.mxu3 %v706_v1 }
 0x3e7   : > { %727 = vmatpush.msra.mxu3 %v705_v2 }
 0x3e8   : > { %869 = vmatmul.msk.f32.vlgmr.msra.gmra.mxu2 %vm356_vm8, %v590_v37 }
 0x445   : > { %v416_v38 = vpop.f32.mrf.mxu2 }
 0x463   : > { %v482_v39 = vpop.f32.mrf.mxu2  ;;  %v548_v40 = vpop.f32.mrf.mxu3 }
 0x464   : > { %622 = vrot.lane.b32.xlu1 %v548_v40, %s1168_s13  ;;  %618 = vrot.lane.b32.xlu0 %v482_v39, %s1169_s26  ;;  %s1094_s13 = sshra.s32 %s756_s7, 4  ;;  %s1095_s13 = int_to_ptr.hbm [resolvable:$true] %s1094_s13 }
 0x465   : > { %s1096_s26 = scalar_lea.hbm %s1095_s13, 8  ;;  %p1101_p12 = scmp.lt.s32.totalorder %s1095_s13, %s1416_s5 }
 0x466   : > { %p1097_p1 = scmp.ne.s32.totalorder %s1095_s13, %s1096_s26  ;;  %p1102_p7 = scmp.lt.s32.totalorder %s1100_s6, %s1096_s26 }
 0x468   : > { %p1098_p3 = pnand %p1097_p1, %p1270_p4  ;;  %p1103_p8 = por %p1102_p7, %p1101_p12 }
 0x46a   : > { %p1099_p5 = pneg %p1098_p3 }
 0x46b   : > { %v614_v41 = vpop.f32.mrf.mxu2 }
 0x46c   : > { %626 = vrot.lane.b32.xlu2 %v614_v41, %s1170_s17  ;;  %p1104_p9 = pnand %p1103_p8, %p1099_p5 }
 0x4c6   : > { %v627_v49 = vpop.permute.xlu2 %626 }
 0x4d6   : > { %v619_v46 = vpop.permute.xlu0 %618  ;;  %v623_v47 = vpop.permute.xlu1 %622 }
 0x4d7   : > { %v629_v48 = vsel %vm356_vm8, %v416_v38, %v619_v46 }
 0x4d8   : > { %v631_v50 = vsel %vm630_vm9, %v629_v48, %v623_v47 }
 0x4d9   : > { %v633_v51 = vsel %vm632_vm10, %v631_v50, %v627_v49 }
 0x4da   : > { %870 = vmatmul.msk.f32.vlgmr.msra.gmra.mxu1 %vm276_vm0, %v633_v51 }
 0x557   : > { %v662_v53 = vpop.f32.mrf.mxu1 }
 0x558   : > { %v663_v54 = vadd.f32 %v962_v52, %v662_v53 }
 0x55a   : > { %v665_v55 = vadd.f32 %v663_v54, %v1315_v0 }
 0x55c   : > { %v666_v56 = vsel %vm276_vm0, %v665_v55, 0.0 }
 0x55d   : > { %667 = vadd.xlane.f32.xlu0 %v666_v56 }
 0x5d0   : > { %v668_v57 = vpop.xlane.xlu0 %667 }
 0x5d1   : > { %v669_v58 = vmul.f32 %v668_v57, %v1319_v8 }
 0x5d3   : > { %v670_v59 = vsub.f32 %v665_v55, %v669_v58 }
 0x5d5   : > { %v671_v60 = vmul.f32 %v670_v59, %v670_v59 }
 0x5d7   : > { %v672_v61 = vsel %vm276_vm0, %v671_v60, 0.0 }
 0x5d8   : > { %673 = vadd.xlane.f32.xlu1 %v672_v61 }
 0x64b   : > { %v674_v3 = vpop.xlane.xlu1 %673 }
 0x64c   : > { %v675_v0 = vmul.f32 0.032258064, %v674_v3 }
 0x64e   : > { %986 = vrsqrt.f32 %v675_v0  ;;  %vm683_vm11 = vcmp.eq.f32.partialorder %v675_v0, inf  ;;  %v686_v11 = vand.u32 2147483648, %v675_v0  ;;  %vm685_vm12 = vcmp.eq.f32.partialorder %v675_v0, 0.0 }
 0x654   : > { %v987_v4 = vpop.eup %986 }
 0x655   : > { %v677_v5 = vmul.f32 %v987_v4, %v675_v0 }
 0x657   : > { %v678_v6 = vmul.f32 %v987_v4, %v677_v5 }
 0x659   : > { %v679_v8 = vmul.f32 0.5, %v678_v6 }
 0x65b   : > { %v680_v7 = vsub.f32 1.5, %v679_v8 }
 0x65d   : > { %v681_v9 = vmul.f32 %v987_v4, %v680_v7 }
 0x65f   : > { %v682_v10 = vmul.f32 %v681_v9, %v675_v0 }
 0x661   : > { %v684_v12 = vsel %vm683_vm11, %v675_v0, %v682_v10 }
 0x662   : > { %v687_v13 = vsel %vm685_vm12, %v686_v11, %v684_v12 }
 0x663   : > { %v688_v14 = vadd.f32 1e-06, %v687_v13 }
 0x665   : > { %988 = vrcp.f32 %v688_v14  ;;  %v700_v18 = vand.u32 2147483648, %v688_v14  ;;  %v698_v20 = vand.u32 2147483647, %v688_v14  ;;  %vm694_vm14 = vweird.f32 %v688_v14 }
 0x667   : > { %v701_v22 = vor.u32 1.1754944e-38, %v700_v18  ;;  %vm699_vm1 = vcmp.eq.f32.partialorder %v698_v20, 8.507059e+37 }
 0x66b   : > { %v989_v15 = vpop.eup %988 }
 0x66c   : > { %v690_v16 = vmul.f32 %v989_v15, %v688_v14  ;;  %vm695_vm13 = vweird.f32 %v989_v15 }
 0x66d   : > { %vm696_vm15 = vmor %vm694_vm14, %vm695_vm13 }
 0x66e   : > { %v691_v17 = vsub.f32 1.0, %v690_v16 }
 0x670   : > { %v692_v19 = vmul.f32 %v989_v15, %v691_v17 }
 0x672   : > { %v693_v21 = vadd.f32 %v989_v15, %v692_v19 }
 0x674   : > { %v697_v23 = vsel %vm696_vm15, %v989_v15, %v693_v21 }
 0x675   : > { %v702_v24 = vsel %vm699_vm1, %v701_v22, %v697_v23 }
 0x676   : > { %v703_v25 = vmul.f32 %v702_v24, %v670_v59 }
 0x678   : > { %871 = vmatmul.msk.f32.vlgmr.msra.gmra.mxu3 %vm276_vm0, %v703_v25 }
 0x6fb   : > { %v729_v27 = vpop.f32.mrf.mxu3 }
 0x6fc   : > { %v732_v28 = vadd.f32 %v729_v27, %v665_v55 }
 0x6fe   : > { %v738_v29 = vadd.f32 %v963_v26, %v732_v28 }
 0x700   : > { %739 = vst.msk [vmem:[%s274_s30] sm:$0xff] %vm276_vm0, %v738_v29 }
 0x701   : > { %1107 = shalt.err (!%p1104_p9)
}
 0x702   : > { %887 = dma.vmem_to_hbm [thread:$0]  (%p1270_p4), %s754_s16, 128, %s756_s7, %s741_s25  }
 0x703 PF: > { %s767_s22 = sand.u32 1, %s1138_s18   ;;  %p1423_p10 = scmp.ge.s32.totalorder %s1150_s21, 2 }
 0x704   : > { %s768_s11 = scalar_lea.sflag [#allocation4], %s767_s22 }
 0x705   : > { %p901_p13 = pnand %p1423_p10, %p1274_p6 }
 0x707   : > { %p902_p11 = pneg %p901_p13 }
 0x709   : > { %1133 = dma.done.wait (%p902_p11), %s768_s11, 128  }
 0x70a   : > { %1135 = vsyncadd (%p902_p11), %s768_s11, 4294967168  ;;  %p19_p0 = scmp.ge.s32.totalorder %s1244_s12, 4   ;;  %s1424_s18 = smov %s1142_s19 }
 0x70b   : > { %s1425_s19 = smov %s1146_s20  ;;  %s1426_s20 = smov %s1255_s15 }
 0x70c   : > { %s1427_s21 = smov %s1244_s12  ;;  %21 = sbr.rel (!%p19_p0) target bundleno = 6 (0x6), region = 95 }
 0x711   :  { %774 = vsyncpa [#allocation3], 1 }
 0x712   :  { %776 = vsyncpa [#allocation3 + $0x1], 1 }
 0x713   :  { %777 = vsyncpa [#allocation6], 1 }
 0x714   :  { %778 = vsyncpa [#allocation4], 1 }
 0x715   :  { %780 = vsyncpa [#allocation4 + $0x1], 1 }

</bundles_post_ra>
